<compile_context>
chip_gen: v7x
topology: tpu7x:2x2x1
jax: 0.10.0
libtpu: 0.0.40
codegen_flags: <defaults>
</compile_context>

<pallas_src>
import functools

import jax
import jax.numpy as jnp
from jax.experimental import pallas as pl
from jax.experimental.pallas import tpu as pltpu

_LANE = 128


def _round_up(x, m):
    return (x + m - 1) // m * m


def _sublane_multiple(dtype):
    # Sublane packing of the M axis: 8 rows for 4-byte, 16 for 2-byte, 32 for 1-byte dtypes.
    return {4: 8, 2: 16, 1: 32}.get(jnp.dtype(dtype).itemsize, 8)


def _vmem_capacity_bytes():
    try:
        return int(pltpu.get_tpu_info().vmem_capacity_bytes)
    except Exception:
        return 64 * 1024 * 1024  # conservative: v7x per-TC VMEM


# ---------------------------------------------------------------------------
# Kernels
# ---------------------------------------------------------------------------
def _mlp2_kernel_resident(x_ref, w1_ref, b1_ref, w2_ref, b2_ref, o_ref):
    """Both weight matrices VMEM-resident; one grid axis over M."""
    h = jnp.dot(x_ref[...], w1_ref[...], preferred_element_type=jnp.float32)
    h = jnp.maximum(h + b1_ref[...], 0.0)           # bias + ReLU in f32
    # nn.Dropout(p=0.0) is the identity in train and eval -> elided.
    if h.dtype != w2_ref.dtype:                     # cast only for sub-f32 weights
        h = h.astype(w2_ref.dtype)
    out = jnp.dot(h, w2_ref[...], preferred_element_type=jnp.float32)
    o_ref[...] = (out + b2_ref[...]).astype(o_ref.dtype)


def _mlp2_kernel_ktiled(x_ref, w1_ref, b1_ref, w2_ref, b2_ref, o_ref, acc_ref):
    """Streams W1 column-tiles / W2 row-tiles over a trailing 'arbitrary' K axis (D_mid)."""
    k = pl.program_id(1)

    @pl.when(k == 0)
    def _():
        acc_ref[...] = jnp.zeros_like(acc_ref)

    h = jnp.dot(x_ref[...], w1_ref[...], preferred_element_type=jnp.float32)
    h = jnp.maximum(h + b1_ref[...], 0.0)           # ReLU is per hidden column -> K-tiling exact
    if h.dtype != w2_ref.dtype:
        h = h.astype(w2_ref.dtype)
    acc_ref[...] += jnp.dot(h, w2_ref[...], preferred_element_type=jnp.float32)

    @pl.when(k == pl.num_programs(1) - 1)
    def _():
        o_ref[...] = (acc_ref[...] + b2_ref[...]).astype(o_ref.dtype)


# ---------------------------------------------------------------------------
# One-time parameter preparation (pad at init, never per call)
# ---------------------------------------------------------------------------
def prepare_params(w1, b1, w2, b2):
    """Pad parameters once to lane-dense multiples of 128. Call at init time."""
    d_in, d_mid = w1.shape
    d_out = w2.shape[1]
    dp_in, dp_mid, dp_out = (_round_up(d, _LANE) for d in (d_in, d_mid, d_out))
    b1 = jnp.reshape(b1, (1, -1))
    b2 = jnp.reshape(b2, (1, -1))
    if (dp_in, dp_mid) != (d_in, d_mid):
        w1 = jnp.pad(w1, ((0, dp_in - d_in), (0, dp_mid - d_mid)))
    if dp_mid != d_mid:
        b1 = jnp.pad(b1, ((0, 0), (0, dp_mid - d_mid)))
    if (dp_mid, dp_out) != (d_mid, d_out):
        w2 = jnp.pad(w2, ((0, dp_mid - d_mid), (0, dp_out - d_out)))
    if dp_out != d_out:
        b2 = jnp.pad(b2, ((0, 0), (0, dp_out - d_out)))
    return w1, b1, w2, b2


# ---------------------------------------------------------------------------
# Forward wrapper (run under jit so the x pad / output slice fuse)
# ---------------------------------------------------------------------------
def mlp2_forward(x, w1, b1, w2, b2, *, d_out=None, block_m=None, block_k=None):
    """x: [B, D_in]; w1/b1/w2/b2 already padded via prepare_params.

    d_out: original (unpadded) output dim used to slice the result.
    block_k: force the K-tiled (streamed weights) path with this D_mid tile.
    """
    dp_in, dp_mid = w1.shape
    dp_out = w2.shape[1]
    if d_out is None:
        d_out = dp_out
    B, d_in = x.shape
    assert d_in <= dp_in, "x feature dim larger than padded weight rows"

    x_it = jnp.dtype(x.dtype).itemsize
    out_it = x_it
    w_it = max(jnp.dtype(w1.dtype).itemsize, jnp.dtype(w2.dtype).itemsize)
    sub = _sublane_multiple(x.dtype)

    vmem_cap = _vmem_capacity_bytes()
    # Leave headroom for Mosaic internal scratch (v7x is the tight case: 64 MiB per TC).
    budget = min(vmem_cap - (8 << 20), int(vmem_cap * 0.85))

    # --- M tile: target ~512 rows, split B evenly so the tail tile isn't mostly padding.
    if block_m is None:
        target = 512
        n_m = 1 if B <= target else -(-B // target)
        block_m = _round_up(-(-B // n_m), sub)
    else:
        block_m = _round_up(block_m, sub)

    # Per-operand-itemsize VMEM estimates (include f32 intermediates & real buffer counts).
    def est_resident(bm):
        return (2 * bm * dp_in * x_it            # x tile, double-buffered
                + 2 * bm * dp_out * out_it       # out tile, double-buffered
                + dp_in * dp_mid * w_it          # W1, single-buffered (resident)
                + dp_mid * dp_out * w_it         # W2, single-buffered (resident)
                + 8 * (dp_mid + dp_out) * 4      # biases (sublane-padded), resident
                + 4 * bm * dp_mid                # fc1 f32 intermediate
                + 4 * bm * dp_out)               # fc2 f32 result

    def est_ktiled(bm, bk):
        return (2 * bm * dp_in * x_it
                + 2 * bm * dp_out * out_it
                + 2 * dp_in * bk * w_it          # W1 column tile, double-buffered
                + 2 * bk * dp_out * w_it         # W2 row tile, double-buffered
                + 2 * 8 * bk * 4 + 8 * dp_out * 4
                + 4 * bm * bk                    # fc1 f32 tile
                + 2 * 4 * bm * dp_out)           # fc2 partial + f32 accumulator

    use_ktiled = block_k is not None
    if not use_ktiled and est_resident(block_m) > budget:
        use_ktiled = True
    if use_ktiled and block_k is None:
        # Largest multiple-of-128 divisor of dp_mid that fits the budget (128 always divides).
        block_k = _LANE
        for cand in range(dp_mid, _LANE - 1, -_LANE):
            if dp_mid % cand == 0 and est_ktiled(block_m, cand) <= budget:
                block_k = cand
                break
        while est_ktiled(block_m, block_k) > budget and block_m > sub:
            block_m = max(sub, _round_up(block_m // 2, sub))
    if use_ktiled:
        assert block_k % _LANE == 0 and dp_mid % block_k == 0, "block_k must divide padded D_mid"

    # --- Activation padding: only when actually needed (no per-call HBM copy otherwise).
    bp = _round_up(B, block_m)
    if bp != B or dp_in != d_in:
        x = jnp.pad(x, ((0, bp - B), (0, dp_in - d_in)))

    # --- VMEM limit: always pass it, sized from the estimate, capped below physical VMEM.
    vmem_est = est_ktiled(block_m, block_k) if use_ktiled else est_resident(block_m)
    vmem_limit = int(min(budget, max(32 << 20, int(vmem_est * 1.25) + (2 << 20))))

    # Advisory cost estimate for XLA's scheduler.
    flops = 2 * bp * (dp_in * dp_mid + dp_mid * dp_out)
    bytes_accessed = int(bp * dp_in * x_it + bp * dp_out * out_it
                         + (dp_in * dp_mid + dp_mid * dp_out) * w_it
                         + (dp_mid + dp_out) * 4)
    cost = pl.CostEstimate(flops=flops, transcendentals=0, bytes_accessed=bytes_accessed)

    resident_mode = pl.Buffered(1)  # constant-index blocks: don't double-buffer them

    if not use_ktiled:
        out_padded = pl.pallas_call(
            _mlp2_kernel_resident,
            out_shape=jax.ShapeDtypeStruct((bp, dp_out), x.dtype),
            grid=(bp // block_m,),
            in_specs=[
                pl.BlockSpec((block_m, dp_in), lambda i: (i, 0)),                 # streamed
                pl.BlockSpec((dp_in, dp_mid), lambda i: (0, 0), pipeline_mode=resident_mode),
                pl.BlockSpec((1, dp_mid), lambda i: (0, 0), pipeline_mode=resident_mode),
                pl.BlockSpec((dp_mid, dp_out), lambda i: (0, 0), pipeline_mode=resident_mode),
                pl.BlockSpec((1, dp_out), lambda i: (0, 0), pipeline_mode=resident_mode),
            ],
            out_specs=pl.BlockSpec((block_m, dp_out), lambda i: (i, 0)),
            compiler_params=pltpu.CompilerParams(
                dimension_semantics=("parallel",),
                vmem_limit_bytes=vmem_limit),
            cost_estimate=cost,
        )(x, w1, b1, w2, b2)
    else:
        # TODO(synk): for short-M / large-D_out cases on v7x, add a second "parallel" grid
        # axis over dp_out tiles so both TensorCores stay busy.
        out_padded = pl.pallas_call(
            _mlp2_kernel_ktiled,
            out_shape=jax.ShapeDtypeStruct((bp, dp_out), x.dtype),
            grid=(bp // block_m, dp_mid // block_k),
            in_specs=[
                pl.BlockSpec((block_m, dp_in), lambda i, k: (i, 0)),
                pl.BlockSpec((dp_in, block_k), lambda i, k: (0, k)),              # streamed over K
                pl.BlockSpec((1, block_k), lambda i, k: (0, k)),
                pl.BlockSpec((block_k, dp_out), lambda i, k: (k, 0)),             # streamed over K
                pl.BlockSpec((1, dp_out), lambda i, k: (0, 0), pipeline_mode=resident_mode),
            ],
            out_specs=pl.BlockSpec((block_m, dp_out), lambda i, k: (i, 0)),
            scratch_shapes=[pltpu.VMEM((block_m, dp_out), jnp.float32)],
            compiler_params=pltpu.CompilerParams(
                dimension_semantics=("parallel", "arbitrary"),
                vmem_limit_bytes=vmem_limit),
            cost_estimate=cost,
        )(x, w1, b1, w2, b2)

    return out_padded[:B, :d_out]


def init_params(key, input_dim, mid_dim, output_dim, dtype=jnp.float32):
    """Deterministic init mimicking nn.Linear default (uniform +/- 1/sqrt(fan_in))."""
    k1, k2, k3, k4 = jax.random.split(key, 4)
    bound1 = 1.0 / (input_dim ** 0.5)
    bound2 = 1.0 / (mid_dim ** 0.5)
    # Stored as [in, out] (transpose of PyTorch's [out, in]).
    w1 = jax.random.uniform(k1, (input_dim, mid_dim), dtype, -bound1, bound1)
    b1 = jax.random.uniform(k2, (1, mid_dim), dtype, -bound1, bound1)
    w2 = jax.random.uniform(k3, (mid_dim, output_dim), dtype, -bound2, bound2)
    b2 = jax.random.uniform(k4, (1, output_dim), dtype, -bound2, bound2)
    return w1, b1, w2, b2


if __name__ == "__main__":
    key = jax.random.PRNGKey(0)

    def ref_fn(x, w1, b1, w2, b2):
        # Pure-JAX reference: fc1 -> relu -> fc2 (dropout p=0.0 is identity).
        return jnp.maximum(x @ w1 + b1.reshape(1, -1), 0.0) @ w2 + b2.reshape(1, -1)

    # --- Case 1: resident-weights path. batch not a multiple of 8, feature dims not
    #     multiples of 128 -> exercises both padding guards and a non-trivial M grid.
    batch, input_dim, mid_dim, output_dim = 20, 32, 64, 16
    kx, kp = jax.random.split(key)
    x = jax.random.normal(kx, (batch, input_dim), jnp.float32)
    w1, b1, w2, b2 = init_params(kp, input_dim, mid_dim, output_dim)
    w1p, b1p, w2p, b2p = prepare_params(w1, b1, w2, b2)          # one-time padding
    fwd = jax.jit(functools.partial(mlp2_forward, d_out=output_dim, block_m=8))
    out = jax.block_until_ready(fwd(x, w1p, b1p, w2p, b2p))
    ref = ref_fn(x, w1, b1, w2, b2)
    assert out.shape == (batch, output_dim)
    assert jnp.allclose(out, ref, atol=1e-5, rtol=1e-5), "mismatch vs reference (resident path)"

    # --- Case 2: force the K-tiled (streamed weights + f32 accumulator) path that large
    #     D_mid would take on v7x: dp_mid = 384 with block_k = 128 -> 3 K-steps.
    batch2, in2, mid2, out2 = 40, 48, 300, 24
    k1, k2 = jax.random.split(kp)
    x2 = jax.random.normal(k1, (batch2, in2), jnp.float32)
    w1b, b1b, w2b, b2b = init_params(k2, in2, mid2, out2)
    p2 = prepare_params(w1b, b1b, w2b, b2b)
    fwd_k = jax.jit(functools.partial(mlp2_forward, d_out=out2, block_m=16, block_k=128))
    out_k = jax.block_until_ready(fwd_k(x2, *p2))
    ref2 = ref_fn(x2, w1b, b1b, w2b, b2b)
    assert out_k.shape == (batch2, out2)
    assert jnp.allclose(out_k, ref2, atol=1e-5, rtol=1e-5), "mismatch vs reference (K-tiled path)"

    print("KERNEL_OK")
</pallas_src>

<mosaic_0001>
module attributes {stable_mosaic.version = 11 : i64} {
  func.func @_mlp2_kernel_resident(%arg0: i32, %arg1: memref<8x128xf32, #tpu.memory_space<vmem>>, %arg2: memref<128x128xf32, #tpu.memory_space<vmem>>, %arg3: memref<1x128xf32, #tpu.memory_space<vmem>>, %arg4: memref<128x128xf32, #tpu.memory_space<vmem>>, %arg5: memref<1x128xf32, #tpu.memory_space<vmem>>, %arg6: memref<8x128xf32, #tpu.memory_space<vmem>>) attributes {dimension_semantics = [#tpu.dimension_semantics<parallel>], iteration_bounds = array<i64: 3>, scalar_prefetch = 0 : i64, scratch_operands = 0 : i64, tpu.core_type = #tpu.core_type<tc>, window_params = [{transform_indices = @transform_0, window_bounds = array<i64: 8, 128>}, {pipeline_mode = #tpu.pipeline_mode<synchronous>, transform_indices = @transform_1, window_bounds = array<i64: 128, 128>}, {pipeline_mode = #tpu.pipeline_mode<synchronous>, transform_indices = @transform_2, window_bounds = array<i64: 1, 128>}, {pipeline_mode = #tpu.pipeline_mode<synchronous>, transform_indices = @transform_3, window_bounds = array<i64: 128, 128>}, {pipeline_mode = #tpu.pipeline_mode<synchronous>, transform_indices = @transform_4, window_bounds = array<i64: 1, 128>}, {transform_indices = @transform_5, window_bounds = array<i64: 8, 128>}]} {
    %c0 = arith.constant 0 : index
    %c0_0 = arith.constant 0 : index
    %0 = vector.load %arg1[%c0, %c0_0] : memref<8x128xf32, #tpu.memory_space<vmem>>, vector<8x128xf32>
    %c0_1 = arith.constant 0 : index
    %c0_2 = arith.constant 0 : index
    %1 = vector.load %arg2[%c0_1, %c0_2] : memref<128x128xf32, #tpu.memory_space<vmem>>, vector<128x128xf32>
    %cst = arith.constant dense<0.000000e+00> : vector<8x128xf32>
    %2 = tpu.matmul %0, %1, %cst {dimension_numbers = #tpu.dot_dimension_numbers<[1], [0], [0], [1], [0, 0, 1, 1], [], []>} : vector<8x128xf32>, vector<128x128xf32>, vector<8x128xf32> -> vector<8x128xf32>
    %c0_3 = arith.constant 0 : index
    %c0_4 = arith.constant 0 : index
    %3 = vector.load %arg3[%c0_3, %c0_4] : memref<1x128xf32, #tpu.memory_space<vmem>>, vector<1x128xf32>
    %4 = vector.broadcast %3 : vector<1x128xf32> to vector<8x128xf32>
    %5 = arith.addf %2, %4 : vector<8x128xf32>
    %cst_5 = arith.constant 0.000000e+00 : f32
    %6 = vector.broadcast %cst_5 : f32 to vector<8x128xf32>
    %7 = arith.maximumf %5, %6 : vector<8x128xf32>
    %c0_6 = arith.constant 0 : index
    %c0_7 = arith.constant 0 : index
    %8 = vector.load %arg4[%c0_6, %c0_7] : memref<128x128xf32, #tpu.memory_space<vmem>>, vector<128x128xf32>
    %cst_8 = arith.constant dense<0.000000e+00> : vector<8x128xf32>
    %9 = tpu.matmul %7, %8, %cst_8 {dimension_numbers = #tpu.dot_dimension_numbers<[1], [0], [0], [1], [0, 0, 1, 1], [], []>} : vector<8x128xf32>, vector<128x128xf32>, vector<8x128xf32> -> vector<8x128xf32>
    %c0_9 = arith.constant 0 : index
    %c0_10 = arith.constant 0 : index
    %10 = vector.load %arg5[%c0_9, %c0_10] : memref<1x128xf32, #tpu.memory_space<vmem>>, vector<1x128xf32>
    %11 = vector.broadcast %10 : vector<1x128xf32> to vector<8x128xf32>
    %12 = arith.addf %9, %11 : vector<8x128xf32>
    %c0_11 = arith.constant 0 : index
    %c0_12 = arith.constant 0 : index
    %13 = vector.load %arg6[%c0_11, %c0_12] : memref<8x128xf32, #tpu.memory_space<vmem>>, vector<8x128xf32>
    tpu.vector_store %arg6[%c0_11, %c0_12], %12 {strides = array<i32>} : memref<8x128xf32, #tpu.memory_space<vmem>>, vector<8x128xf32>,
    return
  }
  func.func @transform_0(%arg0: i32) -> (i32, i32) {
    %c0_i32 = arith.constant 0 : i32
    %c0_i32_0 = arith.constant 0 : i32
    return %arg0, %c0_i32 : i32, i32
  }
  func.func @transform_1(%arg0: i32) -> (i32, i32) {
    %c0_i32 = arith.constant 0 : i32
    %c0_i32_0 = arith.constant 0 : i32
    %c0_i32_1 = arith.constant 0 : i32
    return %c0_i32, %c0_i32_0 : i32, i32
  }
  func.func @transform_2(%arg0: i32) -> (i32, i32) {
    %c0_i32 = arith.constant 0 : i32
    %c0_i32_0 = arith.constant 0 : i32
    %c0_i32_1 = arith.constant 0 : i32
    return %c0_i32, %c0_i32_0 : i32, i32
  }
  func.func @transform_3(%arg0: i32) -> (i32, i32) {
    %c0_i32 = arith.constant 0 : i32
    %c0_i32_0 = arith.constant 0 : i32
    %c0_i32_1 = arith.constant 0 : i32
    return %c0_i32, %c0_i32_0 : i32, i32
  }
  func.func @transform_4(%arg0: i32) -> (i32, i32) {
    %c0_i32 = arith.constant 0 : i32
    %c0_i32_0 = arith.constant 0 : i32
    %c0_i32_1 = arith.constant 0 : i32
    return %c0_i32, %c0_i32_0 : i32, i32
  }
  func.func @transform_5(%arg0: i32) -> (i32, i32) {
    %c0_i32 = arith.constant 0 : i32
    %c0_i32_0 = arith.constant 0 : i32
    return %arg0, %c0_i32 : i32, i32
  }
}

</mosaic_0001>

<bundles_post_ra>
// kernel: mlp2_forward.1
= control target key start
LH: loop header
LB: loop body
LE: loop exit
PB: predicated region body
PF: predicated region fallthrough
CT: control target
= control target key end

     0   :  { %10 = vsyncpa [#allocation3], 0  ;;  %s946_s0 = inlined_call_operand.vmem [shape: f32[24,128], index: 0, kind: input, shape index: {}]   ;;  %s947_s1 = inlined_call_operand.hbm [shape: f32[128,128], index: 1, kind: input, shape index: {}]   ;;  %s948_s2 = inlined_call_operand.vmem [shape: f32[1,128], index: 2, kind: input, shape index: {}]   ;;  %s949_s3 = inlined_call_operand.hbm [shape: f32[128,128], index: 3, kind: input, shape index: {}]   ;;  %s950_s4 = inlined_call_operand.vmem [shape: f32[1,128], index: 4, kind: input, shape index: {}]   ;;  %s951_s5 = inlined_call_operand.vmem [shape: f32[24,128], index: 5, kind: output, shape index: {}]  }
   0x1   :  { %11 = vsyncpa [#allocation5], 0  ;;  %s824_s18 = smov 0  }
   0x2 LB: > { %s830_s19 = sadd.s32 4294967295, %s785_s18   ;;  %p516_p0 = scmp.ge.s32.totalorder %s785_s18, 1  ;;  %s785_s18 = sphi %s824_s18, %s17_s18  }
   0x3   : > { %p158_p1 = scmp.lt.s32.totalorder %s785_s18, 4  ;;  %s787_s20 = smov [#allocation2]  }
   0x4   : > { %s170_s21 = sshll.u32 %s787_s20, 4  ;;  %p952_p3 = scmp.eq.s32.totalorder %s830_s19, 0  ;;  %s171_s21 = int_to_ptr.vmem [resolvable:$true] %s170_s21 }
   0x5   : > { %p834_p2 = pnand %p516_p0, %p158_p1  ;;  %s788_s23 = smov [#allocation4]  }
   0x6   : > { %s186_s24 = sshll.u32 %s788_s23, 4  ;;  %s715_s28 = scalar_lea.hbm %s947_s1, 2048  ;;  %s847_s24 = int_to_ptr.vmem [resolvable:$true] %s186_s24 }
   0x7   : > { %s954_s22 = scalar_select %p834_p2, 1, 0 }
   0x8   : > { %p689_p4 = pneg %p834_p2  ;;  %p716_p6 = scmp.ne.s32.totalorder %s947_s1, %s715_s28 }
   0x9   : > { %p722_p10 = scmp.lt.u32.totalorder %s715_s28, %s947_s1 }
   0xa   : > { %p843_p5 = pnand %p952_p3, %p689_p4 }
   0xc   : > { %p717_p7 = pneg %p843_p5 }
   0xe   : > { %p718_p8 = pnand %p717_p7, %p716_p6 }
  0x10   : > { %p719_p9 = pneg %p718_p8 }
  0x12   : > { %p724_p11 = pnand %p722_p10, %p719_p9 }
  0x14   : > { %727 = shalt.err (!%p724_p11)
}
  0x15   : > { %s728_s8 = scalar_lea.vmem %s171_s21, 2048  ;;  %p736_p1 = scmp.lt.s32.totalorder %s171_s21, %s171_s21 }
  0x16   : > { %p729_p12 = scmp.ne.s32.totalorder %s171_s21, %s728_s8  ;;  %p737_p4 = scmp.lt.s32.totalorder %s728_s8, %s728_s8 }
  0x18   : > { %p731_p13 = pnand %p729_p12, %p717_p7  ;;  %p738_p3 = por %p737_p4, %p736_p1 }
  0x1a   : > { %p732_p0 = pneg %p731_p13 }
  0x1c   : > { %p739_p2 = pnand %p738_p3, %p732_p0 }
  0x1e   : > { %742 = shalt.err (!%p739_p2)
}
  0x1f   : > { %s789_s9 = smov 128   ;;  %s790_s10 = smov 8  }
  0x20   : > { %692 = dma.hbm_to_vmem [thread:$0]  (!%p843_p5), %s947_s1, 2048, %s171_s21, [#allocation3], %s789_s9, %s789_s9, %s790_s10  }
  0x21   : > { %s743_s15 = scalar_lea.hbm %s949_s3, 2048 }
  0x22   : > { %p744_p6 = scmp.ne.s32.totalorder %s949_s3, %s743_s15  ;;  %p750_p8 = scmp.lt.u32.totalorder %s743_s15, %s949_s3 }
  0x24   : > { %p746_p2 = pnand %p744_p6, %p717_p7 }
  0x26   : > { %p747_p3 = pneg %p746_p2 }
  0x28   : > { %p752_p9 = pnand %p750_p8, %p747_p3 }
  0x2a   : > { %755 = shalt.err (!%p752_p9)
}
  0x2b   : > { %s756_s21 = scalar_lea.vmem %s847_s24, 2048  ;;  %p764_p13 = scmp.lt.s32.totalorder %s847_s24, %s847_s24 }
  0x2c   : > { %p757_p10 = scmp.ne.s32.totalorder %s847_s24, %s756_s21  ;;  %p765_p0 = scmp.lt.s32.totalorder %s756_s21, %s756_s21 }
  0x2e   : > { %p759_p11 = pnand %p757_p10, %p717_p7  ;;  %p766_p1 = por %p765_p0, %p764_p13 }
  0x30   : > { %p760_p12 = pneg %p759_p11 }
  0x32   : > { %p767_p4 = pnand %p766_p1, %p760_p12 }
  0x34   : > { %770 = shalt.err (!%p767_p4)
}
  0x35   : > { %695 = dma.hbm_to_vmem [thread:$0]  (!%p843_p5), %s949_s3, 2048, %s847_s24, [#allocation5], %s789_s9, %s789_s9, %s790_s10  }
  0x36   : > { %p956_p6 = scmp.ne.s32.totalorder %s954_s22, 0 }
  0x37   : > { %p957_p2 = scmp.eq.s32.totalorder (!%p956_p6), %s830_s19, 0 }
  0x38   : > { %212 = sbr.rel (%p956_p6) target bundleno = 532 (0x214), region = 40 }
  0x3f   : > { %776 = dma.done.wait (%p957_p2), [#allocation3], 2048   ;;  %p958_p7 = pmov %p957_p2 }
  0x40   : > { %p959_p3 = pmov %p957_p2 }
  0x41   : > { %778 = vsyncadd (%p958_p7), [#allocation3], 4294965248 }
  0x42   : > { %780 = dma.done.wait (%p959_p3), [#allocation5], 2048   ;;  %p960_p8 = pmov %p957_p2 }
  0x43   : > { %v791_v0 = vmov 0.0|0.0   ;;  %vm792_vm0 = vmmov 0   ;;  %v793_v1 = vmov 0.0   ;;  %v251_v2 = vld [vmem:[#allocation2] sm:$0xff]  ;;  %v252_v3 = vld [vmem:[#allocation2 + $0x8] sm:$0xff]  ;;  %v253_v4 = vld [vmem:[#allocation2 + $0x10] sm:$0xff] }
  0x44   : > { %782 = vsyncadd (%p960_p8), [#allocation5], 4294965248  ;;  %633 = vmatprep.subr.bf16.mxu0 %v791_v0  ;;  %595 = vmatprep.mubr.msk.f32.mxu0 %vm792_vm0, %v793_v1  ;;  %v634_v5 = vpack.c.bf16 %v252_v3, %v251_v2  ;;  %v254_v6 = vld [vmem:[#allocation2 + $0x18] sm:$0xff]  ;;  %v255_v8 = vld [vmem:[#allocation2 + $0x20] sm:$0xff]  ;;  %p242_p5 = scmp.lt.s32.totalorder %s830_s19, 2 }
  0x45   : > { %657 = vmatprep.subr.bf16.mxu1 %v791_v0  ;;  %630 = vmatprep.mubr.msk.f32.mxu1 %vm792_vm0, %v793_v1  ;;  %v637_v7 = vpack.c.bf16 %v254_v6, %v253_v4  ;;  %v256_v9 = vld [vmem:[#allocation2 + $0x28] sm:$0xff]  ;;  %v345_v10 = vld [vmem:[#allocation4] sm:$0xff]  ;;  %v347_v12 = vld [vmem:[#allocation4 + $0x10] sm:$0xff] }
  0x46   : > { %635 = vmatpush3.bf16.msra.mxu0 %v634_v5  ;;  %v346_v11 = vld [vmem:[#allocation4 + $0x8] sm:$0xff]  ;;  %v348_v13 = vld [vmem:[#allocation4 + $0x18] sm:$0xff]  ;;  %v640_v14 = vpack.c.bf16 %v256_v9, %v255_v8  ;;  %v257_v16 = vld [vmem:[#allocation2 + $0x30] sm:$0xff]  ;;  %s962_s19 = smov (!%p242_p5, %s830_s19), 2 }
  0x47   : > { %636 = vmatprep.subr.bf16.mxu0 %v791_v0  ;;  %v658_v15 = vpack.c.bf16 %v346_v11, %v345_v10  ;;  %v258_v17 = vld [vmem:[#allocation2 + $0x38] sm:$0xff]  ;;  %v661_v18 = vpack.c.bf16 %v348_v13, %v347_v12  ;;  %v349_v19 = vld [vmem:[#allocation4 + $0x20] sm:$0xff]  ;;  %v350_v20 = vld [vmem:[#allocation4 + $0x28] sm:$0xff]  ;;  %s523_s22 = sshll.u32 %s962_s19, 3 }
  0x48   : > { %v643_v21 = vpack.c.bf16 %v258_v17, %v257_v16  ;;  %v259_v22 = vld [vmem:[#allocation2 + $0x40] sm:$0xff]  ;;  %v260_v23 = vld [vmem:[#allocation2 + $0x48] sm:$0xff]  ;;  %v664_v24 = vpack.c.bf16 %v350_v20, %v349_v19  ;;  %v351_v25 = vld [vmem:[#allocation4 + $0x30] sm:$0xff]  ;;  %s245_s28 = scalar_lea.vmem %s946_s0, %s523_s22  ;;  %s249_s10 = scalar_lea.vmem %s951_s5, %s523_s22 }
  0x49   : > { %659 = vmatpush3.bf16.msra.mxu1 %v658_v15  ;;  %v352_v26 = vld [vmem:[#allocation4 + $0x38] sm:$0xff]  ;;  %v646_v27 = vpack.c.bf16 %v260_v23, %v259_v22  ;;  %v261_v28 = vld [vmem:[#allocation2 + $0x50] sm:$0xff]  ;;  %v353_v31 = vld [vmem:[#allocation4 + $0x40] sm:$0xff] }
  0x4a   : > { %638 = vmatpush3.bf16.msra.mxu0 %v637_v7  ;;  %660 = vmatprep.subr.bf16.mxu1 %v791_v0  ;;  %v262_v29 = vld [vmem:[#allocation2 + $0x58] sm:$0xff]  ;;  %v667_v30 = vpack.c.bf16 %v352_v26, %v351_v25  ;;  %v354_v32 = vld [vmem:[#allocation4 + $0x48] sm:$0xff]  ;;  %v263_v34 = vld [vmem:[#allocation2 + $0x60] sm:$0xff] }
  0x4b   : > { %639 = vmatprep.subr.bf16.mxu0 %v791_v0  ;;  %v649_v33 = vpack.c.bf16 %v262_v29, %v261_v28  ;;  %v264_v35 = vld [vmem:[#allocation2 + $0x68] sm:$0xff]  ;;  %v670_v36 = vpack.c.bf16 %v354_v32, %v353_v31  ;;  %v355_v37 = vld [vmem:[#allocation4 + $0x50] sm:$0xff]  ;;  %v356_v38 = vld [vmem:[#allocation4 + $0x58] sm:$0xff] }
  0x4c   : > { %v652_v39 = vpack.c.bf16 %v264_v35, %v263_v34  ;;  %v265_v40 = vld [vmem:[#allocation2 + $0x70] sm:$0xff]  ;;  %v266_v41 = vld [vmem:[#allocation2 + $0x78] sm:$0xff]  ;;  %v673_v42 = vpack.c.bf16 %v356_v38, %v355_v37  ;;  %v357_v43 = vld [vmem:[#allocation4 + $0x60] sm:$0xff] }
  0x4d   : > { %662 = vmatpush3.bf16.msra.mxu1 %v661_v18  ;;  %v358_v44 = vld [vmem:[#allocation4 + $0x68] sm:$0xff]  ;;  %v655_v45 = vpack.c.bf16 %v266_v41, %v265_v40  ;;  %v250_v47 = vld [vmem:[%s245_s28] sm:$0xff]  ;;  %v359_v48 = vld [vmem:[#allocation4 + $0x70] sm:$0xff] }
  0x4e   : > { %641 = vmatpush3.bf16.msra.mxu0 %v640_v14  ;;  %663 = vmatprep.subr.bf16.mxu1 %v791_v0  ;;  %v676_v46 = vpack.c.bf16 %v358_v44, %v357_v43  ;;  %v360_v49 = vld [vmem:[#allocation4 + $0x78] sm:$0xff]  ;;  %v525_v51 = vld [vmem:[%s948_s2] ss:$0 sm:$0xff] }
  0x4f   : > { %642 = vmatprep.subr.bf16.mxu0 %v791_v0  ;;  %v679_v50 = vpack.c.bf16 %v360_v49, %v359_v48  ;;  %v526_v56 = vld [vmem:[%s950_s4] ss:$0 sm:$0xff] }
  0x51   : > { %665 = vmatpush3.bf16.msra.mxu1 %v664_v24 }
  0x52   : > { %644 = vmatpush3.bf16.msra.mxu0 %v643_v21  ;;  %666 = vmatprep.subr.bf16.mxu1 %v791_v0 }
  0x53   : > { %645 = vmatprep.subr.bf16.mxu0 %v791_v0 }
  0x55   : > { %668 = vmatpush3.bf16.msra.mxu1 %v667_v30 }
  0x56   : > { %647 = vmatpush3.bf16.msra.mxu0 %v646_v27  ;;  %669 = vmatprep.subr.bf16.mxu1 %v791_v0 }
  0x57   : > { %648 = vmatprep.subr.bf16.mxu0 %v791_v0 }
  0x59   : > { %671 = vmatpush3.bf16.msra.mxu1 %v670_v36 }
  0x5a   : > { %650 = vmatpush3.bf16.msra.mxu0 %v649_v33  ;;  %672 = vmatprep.subr.bf16.mxu1 %v791_v0 }
  0x5b   : > { %651 = vmatprep.subr.bf16.mxu0 %v791_v0 }
  0x5d   : > { %674 = vmatpush3.bf16.msra.mxu1 %v673_v42 }
  0x5e   : > { %653 = vmatpush3.bf16.msra.mxu0 %v652_v39  ;;  %675 = vmatprep.subr.bf16.mxu1 %v791_v0 }
  0x5f   : > { %654 = vmatprep.subr.bf16.mxu0 %v791_v0 }
  0x61   : > { %677 = vmatpush3.bf16.msra.mxu1 %v676_v46 }
  0x62   : > { %656 = vmatpush3.bf16.msra.mxu0 %v655_v45  ;;  %678 = vmatprep.subr.bf16.mxu1 %v791_v0 }
  0x65   : > { %596 = vmatmul.mubr.f32.vlgmr.msra.gmra.mrb[0].mxu0 %v250_v47  ;;  %680 = vmatpush3.bf16.msra.mxu1 %v679_v50 }
 0x138   : > { %v340_v52 = vpop.f32.mrb[0].mxu0 }
 0x139   : > { %v341_v53 = vadd.f32 %v525_v51, %v340_v52  ;;  %v597_v54 = vpop.f32.mrb[1].mxu0 }
 0x13b   : > { %v344_v55 = vmax.f32 %v341_v53, 0.0 }
 0x13d   : > { %631 = vmatmul.mubr.f32.vlgmr.msra.gmra.mrb[0].mxu1 %v344_v55 }
 0x210   : > { %v434_v57 = vpop.f32.mrb[0].mxu1 }
 0x211   : > { %v435_v58 = vadd.f32 %v526_v56, %v434_v57  ;;  %v632_v59 = vpop.f32.mrb[1].mxu1 }
 0x213   : > { %438 = vst [vmem:[%s249_s10] sm:$0xff] %v435_v58 }
 0x214 PF: > { %s17_s18 = sadd.s32 1, %s785_s18  }
 0x215   : > { %p14_p9 = scmp.ge.s32.totalorder %s17_s18, 5  }
 0x217   :  { %16 = sbr.rel (!%p14_p9) target bundleno = 2 (0x2), region = 79 }
 0x21e   :  { %458 = vsyncpa [#allocation3], 1 }
 0x21f   :  { %460 = vsyncpa [#allocation3 + $0x1], 1 }
 0x220   :  { %461 = vsyncpa [#allocation5], 1 }

</bundles_post_ra>
